<compile_context>
chip_gen: v7x
topology: tpu7x:2x2x1
jax: 0.10.0
libtpu: 0.0.40
codegen_flags: <defaults>
</compile_context>

<pallas_src>
import functools
from typing import NamedTuple

import jax
import jax.numpy as jnp
from jax.experimental import pallas as pl
from jax.experimental.pallas import tpu as pltpu


def _round_up(x, m):
    return ((x + m - 1) // m) * m


def _cdiv(a, b):
    return -(-a // b)


def _vmem_capacity_bytes():
    """Physical VMEM per TensorCore; conservative 64 MiB fallback."""
    try:
        info = pltpu.get_tpu_info()
        cap = getattr(info, "vmem_capacity_bytes", None)
        if cap:
            return int(cap)
    except Exception:
        pass
    return 64 << 20


class _Cfg(NamedTuple):
    in_f: int
    hid: int
    out_f: int
    in_p: int
    hid_p: int
    out_p: int
    tile_h: int
    target_tile_m: int
    sublane: int
    weight_stationary: bool
    vmem_budget: int


# --------------------------------------------------------------------------
# Kernels
# --------------------------------------------------------------------------
def _mlp_kernel_resident(x_ref, w1_ref, b1_ref, w2_ref, b2_ref, o_ref):
    """Weight-stationary path: full (padded) weights live in VMEM."""
    h = jnp.dot(x_ref[...], w1_ref[...], preferred_element_type=jnp.float32)
    h = h + b1_ref[...].astype(jnp.float32)
    # Exact GELU (PyTorch nn.GELU default): 0.5 * x * (1 + erf(x / sqrt(2))).
    h = 0.5 * h * (1.0 + jax.lax.erf(h * (1.0 / jnp.sqrt(2.0))))
    out = jnp.dot(h.astype(w2_ref.dtype), w2_ref[...],
                  preferred_element_type=jnp.float32)
    o_ref[...] = (out + b2_ref[...].astype(jnp.float32)).astype(o_ref.dtype)


def _mlp_kernel_tiled(x_ref, w1_ref, b1_ref, w2_ref, b2_ref, o_ref, acc_ref):
    """Hidden-tiled path: accumulate fc2 partials over the hidden grid axis."""
    hi = pl.program_id(1)

    h = jnp.dot(x_ref[...], w1_ref[...], preferred_element_type=jnp.float32)
    h = h + b1_ref[...].astype(jnp.float32)
    h = 0.5 * h * (1.0 + jax.lax.erf(h * (1.0 / jnp.sqrt(2.0))))
    partial = jnp.dot(h.astype(w2_ref.dtype), w2_ref[...],
                      preferred_element_type=jnp.float32)

    @pl.when(hi == 0)
    def _():
        # Fold bias2 into the first partial sum (no zero-init, no epilogue add).
        acc_ref[...] = partial + b2_ref[...].astype(jnp.float32)

    @pl.when(hi > 0)
    def _():
        acc_ref[...] += partial

    @pl.when(hi == pl.num_programs(1) - 1)
    def _():
        o_ref[...] = acc_ref[...].astype(o_ref.dtype)


# --------------------------------------------------------------------------
# Planning / tiling
# --------------------------------------------------------------------------
def _plan(in_f, hid, out_f, dtype):
    itemsize = jnp.dtype(dtype).itemsize
    sublane = max(8, 32 // itemsize)        # 8 f32, 16 bf16, 32 int8/fp8
    vmem_cap = _vmem_capacity_bytes()
    budget = int(vmem_cap * 0.85)           # leave headroom below physical
    big_vmem = vmem_cap >= (96 << 20)       # 128 MiB parts (v5e/v6e)

    in_p = _round_up(in_f, 128)
    out_p = _round_up(out_f, 128)
    hid_min = _round_up(hid, 128)

    # Weight-stationary if the full weight set (conservatively counting the
    # pipeline's double buffers) uses at most half the budget.
    full_w_bytes = (in_p * hid_min + hid_min * out_p + hid_min + out_p) * itemsize
    weight_stationary = 2 * full_w_bytes <= budget // 2

    if weight_stationary:
        hid_p = hid_min
        tile_h = hid_p
    else:
        # K tiles in 256 granularity for the 2x256^2 MXU (128 also legal on v5e).
        tile_h = min(512 if big_vmem else 256, _round_up(hid, 256))
        hid_p = _round_up(hid, tile_h)

    target_tile_m = 1024 if big_vmem else 512
    return _Cfg(in_f, hid, out_f, in_p, hid_p, out_p, tile_h,
                target_tile_m, sublane, weight_stationary, budget)


def _pick_tile_m(m, cfg, itemsize):
    """Largest row tile whose working set fits the VMEM budget."""
    margin = 2 << 20
    if cfg.weight_stationary:
        fixed = 2 * (cfg.in_p * cfg.hid_p + cfg.hid_p * cfg.out_p
                     + cfg.hid_p + cfg.out_p) * itemsize
        per_row = ((2 * cfg.in_p + 2 * cfg.out_p) * itemsize
                   + cfg.hid_p * (4 + itemsize))            # f32 h + cast copy
    else:
        fixed = 2 * (cfg.in_p * cfg.tile_h + cfg.tile_h * cfg.out_p
                     + cfg.tile_h + cfg.out_p) * itemsize
        per_row = ((2 * cfg.in_p + 2 * cfg.out_p) * itemsize
                   + cfg.out_p * 4                          # f32 accumulator
                   + cfg.tile_h * (4 + itemsize))           # f32 h + cast copy

    tile_m = min(cfg.target_tile_m, _round_up(m, cfg.sublane))
    while tile_m > cfg.sublane and fixed + tile_m * per_row + margin > cfg.vmem_budget:
        tile_m = _round_up(tile_m // 2, cfg.sublane)

    # Give the "parallel" row axis >= 2 tiles when rows allow so dual-TC chips
    # (v7x) shard the grid.  Only on the weight-stationary path, where splitting
    # does not duplicate weight DMA (constant index maps -> loaded once).
    if cfg.weight_stationary and m > cfg.sublane and m <= tile_m:
        tile_m = max(cfg.sublane, _round_up(_cdiv(m, 2), cfg.sublane))

    return tile_m


# --------------------------------------------------------------------------
# pallas_call wrapper
# --------------------------------------------------------------------------
@functools.partial(jax.jit, static_argnames=("cfg",))
def _apply_impl(x, w1_p, b1_p, w2_p, b2_p, *, cfg):
    dtype = x.dtype
    itemsize = jnp.dtype(dtype).itemsize
    lead = x.shape[:-1]
    x2d = x.reshape(-1, cfg.in_f)
    m = x2d.shape[0]

    tile_m = _pick_tile_m(m, cfg, itemsize)
    m_p = _round_up(m, tile_m)

    if m_p != m or cfg.in_p != cfg.in_f:
        x2d = jnp.pad(x2d, ((0, m_p - m), (0, cfg.in_p - cfg.in_f)))

    if cfg.weight_stationary:
        grid = (m_p // tile_m,)
        in_specs = [
            pl.BlockSpec((tile_m, cfg.in_p), lambda i: (i, 0)),        # x
            pl.BlockSpec((cfg.in_p, cfg.hid_p), lambda i: (0, 0)),     # w1 (resident)
            pl.BlockSpec((1, cfg.hid_p), lambda i: (0, 0)),            # b1
            pl.BlockSpec((cfg.hid_p, cfg.out_p), lambda i: (0, 0)),    # w2 (resident)
            pl.BlockSpec((1, cfg.out_p), lambda i: (0, 0)),            # b2
        ]
        out_spec = pl.BlockSpec((tile_m, cfg.out_p), lambda i: (i, 0))
        scratch = []
        kernel = _mlp_kernel_resident
        dims = ("parallel",)
    else:
        grid = (m_p // tile_m, cfg.hid_p // cfg.tile_h)
        in_specs = [
            pl.BlockSpec((tile_m, cfg.in_p), lambda i, h: (i, 0)),       # x
            pl.BlockSpec((cfg.in_p, cfg.tile_h), lambda i, h: (0, h)),   # w1
            pl.BlockSpec((1, cfg.tile_h), lambda i, h: (0, h)),          # b1
            pl.BlockSpec((cfg.tile_h, cfg.out_p), lambda i, h: (h, 0)),  # w2
            pl.BlockSpec((1, cfg.out_p), lambda i, h: (0, 0)),           # b2
        ]
        out_spec = pl.BlockSpec((tile_m, cfg.out_p), lambda i, h: (i, 0))
        scratch = [pltpu.VMEM((tile_m, cfg.out_p), jnp.float32)]
        kernel = _mlp_kernel_tiled
        dims = ("parallel", "arbitrary")

    out2d = pl.pallas_call(
        kernel,
        out_shape=jax.ShapeDtypeStruct((m_p, cfg.out_p), dtype),
        grid_spec=pltpu.PrefetchScalarGridSpec(
            num_scalar_prefetch=0,
            grid=grid,
            in_specs=in_specs,
            out_specs=out_spec,
            scratch_shapes=scratch,
        ),
        compiler_params=pltpu.CompilerParams(
            dimension_semantics=dims,
            vmem_limit_bytes=int(cfg.vmem_budget),
        ),
    )(x2d, w1_p, b1_p, w2_p, b2_p)

    out2d = out2d[:m, :cfg.out_f]
    return out2d.reshape(*lead, cfg.out_f)


def make_mlp(w1, b1, w2, b2):
    """Pad/prepare the MLP parameters ONCE and return a jitted apply(x).

    Weight layout is transposed vs. torch.nn.Linear:
      w1: (in_features, hidden), b1: (hidden,), w2: (hidden, out), b2: (out,).
    Zero padding of features/hidden contributes exactly 0 through
    fc1 -> GELU(0)=0 -> fc2; padded rows/cols are sliced off.
    """
    in_f, hid = w1.shape
    out_f = w2.shape[1]
    cfg = _plan(in_f, hid, out_f, w1.dtype)

    if cfg.in_p != in_f or cfg.hid_p != hid:
        w1 = jnp.pad(w1, ((0, cfg.in_p - in_f), (0, cfg.hid_p - hid)))
    b1_p = jnp.pad(b1, (0, cfg.hid_p - hid)).reshape(1, cfg.hid_p)
    if cfg.hid_p != hid or cfg.out_p != out_f:
        w2 = jnp.pad(w2, ((0, cfg.hid_p - hid), (0, cfg.out_p - out_f)))
    b2_p = jnp.pad(b2, (0, cfg.out_p - out_f)).reshape(1, cfg.out_p)

    def apply(x):
        return _apply_impl(x, w1, b1_p, w2, b2_p, cfg=cfg)

    return apply


def mlp_pallas(x, w1, b1, w2, b2):
    """One-shot convenience wrapper (repeated callers should use make_mlp)."""
    return make_mlp(w1, b1, w2, b2)(x)


# --------------------------------------------------------------------------
# Reference / demo
# --------------------------------------------------------------------------
def init_mlp_params(key, in_features, hidden_features, out_features, dtype=jnp.float32):
    """Deterministic synthetic params, shapes matching nn.Linear (stored transposed)."""
    k1, k2, k3, k4 = jax.random.split(key, 4)
    scale1 = 1.0 / jnp.sqrt(in_features)
    scale2 = 1.0 / jnp.sqrt(hidden_features)
    w1 = jax.random.uniform(k1, (in_features, hidden_features), dtype, -scale1, scale1)
    b1 = jax.random.uniform(k2, (hidden_features,), dtype, -scale1, scale1)
    w2 = jax.random.uniform(k3, (hidden_features, out_features), dtype, -scale2, scale2)
    b2 = jax.random.uniform(k4, (out_features,), dtype, -scale2, scale2)
    return w1, b1, w2, b2


def mlp_reference(x, w1, b1, w2, b2):
    h = x @ w1 + b1
    h = 0.5 * h * (1.0 + jax.lax.erf(h / jnp.sqrt(2.0)))
    return h @ w2 + b2


if __name__ == "__main__":
    key = jax.random.PRNGKey(0)
    kx, kp = jax.random.split(key)

    batch, seq = 2, 8           # 16 tokens total
    in_features = 32
    hidden_features = 64
    out_features = 32

    x = jax.random.normal(kx, (batch, seq, in_features), jnp.float32)
    w1, b1, w2, b2 = init_mlp_params(kp, in_features, hidden_features, out_features)

    mlp = make_mlp(w1, b1, w2, b2)   # pads params once, returns jitted apply
    out = jax.block_until_ready(mlp(x))

    ref = mlp_reference(x, w1, b1, w2, b2)
    assert out.shape == (batch, seq, out_features)
    assert jnp.allclose(out, ref, atol=1e-5, rtol=1e-5), "mismatch vs reference"

    print("KERNEL_OK")
</pallas_src>

<mosaic_0001>
module attributes {stable_mosaic.version = 11 : i64} {
  func.func @_mlp_kernel_resident(%arg0: i32, %arg1: memref<8x128xf32, #tpu.memory_space<vmem>>, %arg2: memref<128x128xf32, #tpu.memory_space<vmem>>, %arg3: memref<1x128xf32, #tpu.memory_space<vmem>>, %arg4: memref<128x128xf32, #tpu.memory_space<vmem>>, %arg5: memref<1x128xf32, #tpu.memory_space<vmem>>, %arg6: memref<8x128xf32, #tpu.memory_space<vmem>>) attributes {dimension_semantics = [#tpu.dimension_semantics<parallel>], iteration_bounds = array<i64: 2>, scalar_prefetch = 0 : i64, scratch_operands = 0 : i64, tpu.core_type = #tpu.core_type<tc>, window_params = [{transform_indices = @transform_0, window_bounds = array<i64: 8, 128>}, {pipeline_mode = #tpu.pipeline_mode<synchronous>, transform_indices = @transform_1, window_bounds = array<i64: 128, 128>}, {pipeline_mode = #tpu.pipeline_mode<synchronous>, transform_indices = @transform_2, window_bounds = array<i64: 1, 128>}, {pipeline_mode = #tpu.pipeline_mode<synchronous>, transform_indices = @transform_3, window_bounds = array<i64: 128, 128>}, {pipeline_mode = #tpu.pipeline_mode<synchronous>, transform_indices = @transform_4, window_bounds = array<i64: 1, 128>}, {transform_indices = @transform_5, window_bounds = array<i64: 8, 128>}]} {
    %c0 = arith.constant 0 : index
    %c0_0 = arith.constant 0 : index
    %0 = vector.load %arg1[%c0, %c0_0] : memref<8x128xf32, #tpu.memory_space<vmem>>, vector<8x128xf32>
    %c0_1 = arith.constant 0 : index
    %c0_2 = arith.constant 0 : index
    %1 = vector.load %arg2[%c0_1, %c0_2] : memref<128x128xf32, #tpu.memory_space<vmem>>, vector<128x128xf32>
    %cst = arith.constant dense<0.000000e+00> : vector<8x128xf32>
    %2 = tpu.matmul %0, %1, %cst {dimension_numbers = #tpu.dot_dimension_numbers<[1], [0], [0], [1], [0, 0, 1, 1], [], []>} : vector<8x128xf32>, vector<128x128xf32>, vector<8x128xf32> -> vector<8x128xf32>
    %c0_3 = arith.constant 0 : index
    %c0_4 = arith.constant 0 : index
    %3 = vector.load %arg3[%c0_3, %c0_4] : memref<1x128xf32, #tpu.memory_space<vmem>>, vector<1x128xf32>
    %4 = vector.broadcast %3 : vector<1x128xf32> to vector<8x128xf32>
    %5 = arith.addf %2, %4 : vector<8x128xf32>
    %cst_5 = arith.constant 5.000000e-01 : f32
    %6 = vector.broadcast %cst_5 : f32 to vector<8x128xf32>
    %7 = arith.mulf %6, %5 : vector<8x128xf32>
    %cst_6 = arith.constant 2.000000e+00 : f32
    %8 = math.sqrt %cst_6 : f32
    %cst_7 = arith.constant 1.000000e+00 : f32
    %9 = arith.divf %cst_7, %8 : f32
    %10 = vector.broadcast %9 : f32 to vector<8x128xf32>
    %11 = arith.mulf %5, %10 : vector<8x128xf32>
    %12 = math.erf %11 : vector<8x128xf32>
    %cst_8 = arith.constant 1.000000e+00 : f32
    %13 = vector.broadcast %cst_8 : f32 to vector<8x128xf32>
    %14 = arith.addf %13, %12 : vector<8x128xf32>
    %15 = arith.mulf %7, %14 : vector<8x128xf32>
    %c0_9 = arith.constant 0 : index
    %c0_10 = arith.constant 0 : index
    %16 = vector.load %arg4[%c0_9, %c0_10] : memref<128x128xf32, #tpu.memory_space<vmem>>, vector<128x128xf32>
    %cst_11 = arith.constant dense<0.000000e+00> : vector<8x128xf32>
    %17 = tpu.matmul %15, %16, %cst_11 {dimension_numbers = #tpu.dot_dimension_numbers<[1], [0], [0], [1], [0, 0, 1, 1], [], []>} : vector<8x128xf32>, vector<128x128xf32>, vector<8x128xf32> -> vector<8x128xf32>
    %c0_12 = arith.constant 0 : index
    %c0_13 = arith.constant 0 : index
    %18 = vector.load %arg5[%c0_12, %c0_13] : memref<1x128xf32, #tpu.memory_space<vmem>>, vector<1x128xf32>
    %19 = vector.broadcast %18 : vector<1x128xf32> to vector<8x128xf32>
    %20 = arith.addf %17, %19 : vector<8x128xf32>
    %c0_14 = arith.constant 0 : index
    %c0_15 = arith.constant 0 : index
    %21 = vector.load %arg6[%c0_14, %c0_15] : memref<8x128xf32, #tpu.memory_space<vmem>>, vector<8x128xf32>
    tpu.vector_store %arg6[%c0_14, %c0_15], %20 {strides = array<i32>} : memref<8x128xf32, #tpu.memory_space<vmem>>, vector<8x128xf32>,
    return
  }
  func.func @transform_0(%arg0: i32) -> (i32, i32) {
    %c0_i32 = arith.constant 0 : i32
    %c0_i32_0 = arith.constant 0 : i32
    return %arg0, %c0_i32 : i32, i32
  }
  func.func @transform_1(%arg0: i32) -> (i32, i32) {
    %c0_i32 = arith.constant 0 : i32
    %c0_i32_0 = arith.constant 0 : i32
    %c0_i32_1 = arith.constant 0 : i32
    return %c0_i32, %c0_i32_0 : i32, i32
  }
  func.func @transform_2(%arg0: i32) -> (i32, i32) {
    %c0_i32 = arith.constant 0 : i32
    %c0_i32_0 = arith.constant 0 : i32
    %c0_i32_1 = arith.constant 0 : i32
    return %c0_i32, %c0_i32_0 : i32, i32
  }
  func.func @transform_3(%arg0: i32) -> (i32, i32) {
    %c0_i32 = arith.constant 0 : i32
    %c0_i32_0 = arith.constant 0 : i32
    %c0_i32_1 = arith.constant 0 : i32
    return %c0_i32, %c0_i32_0 : i32, i32
  }
  func.func @transform_4(%arg0: i32) -> (i32, i32) {
    %c0_i32 = arith.constant 0 : i32
    %c0_i32_0 = arith.constant 0 : i32
    %c0_i32_1 = arith.constant 0 : i32
    return %c0_i32, %c0_i32_0 : i32, i32
  }
  func.func @transform_5(%arg0: i32) -> (i32, i32) {
    %c0_i32 = arith.constant 0 : i32
    %c0_i32_0 = arith.constant 0 : i32
    return %arg0, %c0_i32 : i32, i32
  }
}

</mosaic_0001>

<bundles_post_ra>
// kernel: _apply_impl.1
= control target key start
LH: loop header
LB: loop body
LE: loop exit
PB: predicated region body
PF: predicated region fallthrough
CT: control target
= control target key end

     0   :  { %10 = vsyncpa [#allocation3], 0  ;;  %s952_s0 = inlined_call_operand.vmem [shape: f32[16,128], index: 0, kind: input, shape index: {}]   ;;  %s953_s1 = inlined_call_operand.hbm [shape: f32[128,128], index: 1, kind: input, shape index: {}]   ;;  %s954_s2 = inlined_call_operand.vmem [shape: f32[1,128], index: 2, kind: input, shape index: {}]   ;;  %s955_s3 = inlined_call_operand.hbm [shape: f32[128,128], index: 3, kind: input, shape index: {}]   ;;  %s956_s4 = inlined_call_operand.vmem [shape: f32[1,128], index: 4, kind: input, shape index: {}]   ;;  %s957_s5 = inlined_call_operand.vmem [shape: f32[16,128], index: 5, kind: output, shape index: {}]  }
   0x1   :  { %11 = vsyncpa [#allocation5], 0  ;;  %s830_s18 = smov 0  }
   0x2 LB: > { %s836_s19 = sadd.s32 4294967295, %s791_s18   ;;  %p520_p0 = scmp.ge.s32.totalorder %s791_s18, 1  ;;  %s791_s18 = sphi %s830_s18, %s17_s18  }
   0x3   : > { %p158_p1 = scmp.lt.s32.totalorder %s791_s18, 3  ;;  %s793_s20 = smov [#allocation2]  }
   0x4   : > { %s170_s21 = sshll.u32 %s793_s20, 4  ;;  %p958_p3 = scmp.eq.s32.totalorder %s836_s19, 0  ;;  %s171_s21 = int_to_ptr.vmem [resolvable:$true] %s170_s21 }
   0x5   : > { %p840_p2 = pnand %p520_p0, %p158_p1  ;;  %s794_s23 = smov [#allocation4]  }
   0x6   : > { %s186_s24 = sshll.u32 %s794_s23, 4  ;;  %s721_s28 = scalar_lea.hbm %s953_s1, 2048  ;;  %s853_s24 = int_to_ptr.vmem [resolvable:$true] %s186_s24 }
   0x7   : > { %s960_s22 = scalar_select %p840_p2, 1, 0 }
   0x8   : > { %p693_p4 = pneg %p840_p2  ;;  %p722_p6 = scmp.ne.s32.totalorder %s953_s1, %s721_s28 }
   0x9   : > { %p728_p10 = scmp.lt.u32.totalorder %s721_s28, %s953_s1 }
   0xa   : > { %p849_p5 = pnand %p958_p3, %p693_p4 }
   0xc   : > { %p723_p7 = pneg %p849_p5 }
   0xe   : > { %p724_p8 = pnand %p723_p7, %p722_p6 }
  0x10   : > { %p725_p9 = pneg %p724_p8 }
  0x12   : > { %p730_p11 = pnand %p728_p10, %p725_p9 }
  0x14   : > { %733 = shalt.err (!%p730_p11)
}
  0x15   : > { %s734_s8 = scalar_lea.vmem %s171_s21, 2048  ;;  %p742_p1 = scmp.lt.s32.totalorder %s171_s21, %s171_s21 }
  0x16   : > { %p735_p12 = scmp.ne.s32.totalorder %s171_s21, %s734_s8  ;;  %p743_p4 = scmp.lt.s32.totalorder %s734_s8, %s734_s8 }
  0x18   : > { %p737_p13 = pnand %p735_p12, %p723_p7  ;;  %p744_p3 = por %p743_p4, %p742_p1 }
  0x1a   : > { %p738_p0 = pneg %p737_p13 }
  0x1c   : > { %p745_p2 = pnand %p744_p3, %p738_p0 }
  0x1e   : > { %748 = shalt.err (!%p745_p2)
}
  0x1f   : > { %s795_s9 = smov 128   ;;  %s796_s10 = smov 8  }
  0x20   : > { %696 = dma.hbm_to_vmem [thread:$0]  (!%p849_p5), %s953_s1, 2048, %s171_s21, [#allocation3], %s795_s9, %s795_s9, %s796_s10  }
  0x21   : > { %s749_s15 = scalar_lea.hbm %s955_s3, 2048 }
  0x22   : > { %p750_p6 = scmp.ne.s32.totalorder %s955_s3, %s749_s15  ;;  %p756_p8 = scmp.lt.u32.totalorder %s749_s15, %s955_s3 }
  0x24   : > { %p752_p2 = pnand %p750_p6, %p723_p7 }
  0x26   : > { %p753_p3 = pneg %p752_p2 }
  0x28   : > { %p758_p9 = pnand %p756_p8, %p753_p3 }
  0x2a   : > { %761 = shalt.err (!%p758_p9)
}
  0x2b   : > { %s762_s21 = scalar_lea.vmem %s853_s24, 2048  ;;  %p770_p13 = scmp.lt.s32.totalorder %s853_s24, %s853_s24 }
  0x2c   : > { %p763_p10 = scmp.ne.s32.totalorder %s853_s24, %s762_s21  ;;  %p771_p0 = scmp.lt.s32.totalorder %s762_s21, %s762_s21 }
  0x2e   : > { %p765_p11 = pnand %p763_p10, %p723_p7  ;;  %p772_p1 = por %p771_p0, %p770_p13 }
  0x30   : > { %p766_p12 = pneg %p765_p11 }
  0x32   : > { %p773_p4 = pnand %p772_p1, %p766_p12 }
  0x34   : > { %776 = shalt.err (!%p773_p4)
}
  0x35   : > { %699 = dma.hbm_to_vmem [thread:$0]  (!%p849_p5), %s955_s3, 2048, %s853_s24, [#allocation5], %s795_s9, %s795_s9, %s796_s10  }
  0x36   : > { %p962_p6 = scmp.ne.s32.totalorder %s960_s22, 0 }
  0x37   : > { %p963_p2 = scmp.eq.s32.totalorder (!%p962_p6), %s836_s19, 0 }
  0x38   : > { %212 = sbr.rel (%p962_p6) target bundleno = 547 (0x223), region = 40 }
  0x3f   : > { %782 = dma.done.wait (%p963_p2), [#allocation3], 2048   ;;  %p964_p7 = pmov %p963_p2 }
  0x40   : > { %p965_p3 = pmov %p963_p2 }
  0x41   : > { %784 = vsyncadd (%p964_p7), [#allocation3], 4294965248 }
  0x42   : > { %786 = dma.done.wait (%p965_p3), [#allocation5], 2048   ;;  %p966_p8 = pmov %p963_p2 }
  0x43   : > { %v797_v0 = vmov 0.0|0.0   ;;  %vm798_vm0 = vmmov 0   ;;  %v799_v1 = vmov 0.0   ;;  %v251_v2 = vld [vmem:[#allocation2] sm:$0xff]  ;;  %v252_v3 = vld [vmem:[#allocation2 + $0x8] sm:$0xff]  ;;  %v253_v4 = vld [vmem:[#allocation2 + $0x10] sm:$0xff] }
  0x44   : > { %788 = vsyncadd (%p966_p8), [#allocation5], 4294965248  ;;  %637 = vmatprep.subr.bf16.mxu0 %v797_v0  ;;  %599 = vmatprep.mubr.msk.f32.mxu0 %vm798_vm0, %v799_v1  ;;  %v638_v5 = vpack.c.bf16 %v252_v3, %v251_v2  ;;  %v254_v6 = vld [vmem:[#allocation2 + $0x18] sm:$0xff]  ;;  %v255_v8 = vld [vmem:[#allocation2 + $0x20] sm:$0xff]  ;;  %p242_p5 = scmp.lt.s32.totalorder %s836_s19, 1 }
  0x45   : > { %661 = vmatprep.subr.bf16.mxu1 %v797_v0  ;;  %634 = vmatprep.mubr.msk.f32.mxu1 %vm798_vm0, %v799_v1  ;;  %v641_v7 = vpack.c.bf16 %v254_v6, %v253_v4  ;;  %v256_v9 = vld [vmem:[#allocation2 + $0x28] sm:$0xff]  ;;  %v349_v10 = vld [vmem:[#allocation4] sm:$0xff]  ;;  %v351_v12 = vld [vmem:[#allocation4 + $0x10] sm:$0xff] }
  0x46   : > { %639 = vmatpush3.bf16.msra.mxu0 %v638_v5  ;;  %v350_v11 = vld [vmem:[#allocation4 + $0x8] sm:$0xff]  ;;  %v352_v13 = vld [vmem:[#allocation4 + $0x18] sm:$0xff]  ;;  %v644_v14 = vpack.c.bf16 %v256_v9, %v255_v8  ;;  %v257_v16 = vld [vmem:[#allocation2 + $0x30] sm:$0xff]  ;;  %s968_s19 = smov (!%p242_p5, %s836_s19), 1 }
  0x47   : > { %640 = vmatprep.subr.bf16.mxu0 %v797_v0  ;;  %v662_v15 = vpack.c.bf16 %v350_v11, %v349_v10  ;;  %v258_v17 = vld [vmem:[#allocation2 + $0x38] sm:$0xff]  ;;  %v665_v18 = vpack.c.bf16 %v352_v13, %v351_v12  ;;  %v353_v19 = vld [vmem:[#allocation4 + $0x20] sm:$0xff]  ;;  %v354_v20 = vld [vmem:[#allocation4 + $0x28] sm:$0xff]  ;;  %s527_s22 = sshll.u32 %s968_s19, 3 }
  0x48   : > { %v647_v21 = vpack.c.bf16 %v258_v17, %v257_v16  ;;  %v259_v22 = vld [vmem:[#allocation2 + $0x40] sm:$0xff]  ;;  %v260_v23 = vld [vmem:[#allocation2 + $0x48] sm:$0xff]  ;;  %v668_v24 = vpack.c.bf16 %v354_v20, %v353_v19  ;;  %v261_v26 = vld [vmem:[#allocation2 + $0x50] sm:$0xff]  ;;  %s245_s28 = scalar_lea.vmem %s952_s0, %s527_s22  ;;  %s249_s10 = scalar_lea.vmem %s957_s5, %s527_s22 }
  0x49   : > { %663 = vmatpush3.bf16.msra.mxu1 %v662_v15  ;;  %v650_v25 = vpack.c.bf16 %v260_v23, %v259_v22  ;;  %v262_v27 = vld [vmem:[#allocation2 + $0x58] sm:$0xff]  ;;  %v263_v29 = vld [vmem:[#allocation2 + $0x60] sm:$0xff]  ;;  %v264_v30 = vld [vmem:[#allocation2 + $0x68] sm:$0xff] }
  0x4a   : > { %642 = vmatpush3.bf16.msra.mxu0 %v641_v7  ;;  %664 = vmatprep.subr.bf16.mxu1 %v797_v0  ;;  %v653_v28 = vpack.c.bf16 %v262_v27, %v261_v26  ;;  %v656_v31 = vpack.c.bf16 %v264_v30, %v263_v29  ;;  %v265_v32 = vld [vmem:[#allocation2 + $0x70] sm:$0xff]  ;;  %v266_v33 = vld [vmem:[#allocation2 + $0x78] sm:$0xff]  ;;  %v250_v35 = vld [vmem:[%s245_s28] sm:$0xff] }
  0x4b   : > { %643 = vmatprep.subr.bf16.mxu0 %v797_v0  ;;  %v659_v34 = vpack.c.bf16 %v266_v33, %v265_v32  ;;  %v355_v36 = vld [vmem:[#allocation4 + $0x30] sm:$0xff]  ;;  %v356_v37 = vld [vmem:[#allocation4 + $0x38] sm:$0xff]  ;;  %v357_v39 = vld [vmem:[#allocation4 + $0x40] sm:$0xff] }
  0x4c   : > { %v671_v38 = vpack.c.bf16 %v356_v37, %v355_v36  ;;  %v358_v40 = vld [vmem:[#allocation4 + $0x48] sm:$0xff]  ;;  %v359_v42 = vld [vmem:[#allocation4 + $0x50] sm:$0xff]  ;;  %v360_v43 = vld [vmem:[#allocation4 + $0x58] sm:$0xff] }
  0x4d   : > { %666 = vmatpush3.bf16.msra.mxu1 %v665_v18  ;;  %v674_v41 = vpack.c.bf16 %v358_v40, %v357_v39  ;;  %v677_v44 = vpack.c.bf16 %v360_v43, %v359_v42  ;;  %v361_v45 = vld [vmem:[#allocation4 + $0x60] sm:$0xff]  ;;  %v362_v46 = vld [vmem:[#allocation4 + $0x68] sm:$0xff]  ;;  %v363_v48 = vld [vmem:[#allocation4 + $0x70] sm:$0xff] }
  0x4e   : > { %645 = vmatpush3.bf16.msra.mxu0 %v644_v14  ;;  %667 = vmatprep.subr.bf16.mxu1 %v797_v0  ;;  %v680_v47 = vpack.c.bf16 %v362_v46, %v361_v45  ;;  %v364_v49 = vld [vmem:[#allocation4 + $0x78] sm:$0xff]  ;;  %v529_v51 = vld [vmem:[%s954_s2] ss:$0 sm:$0xff] }
  0x4f   : > { %646 = vmatprep.subr.bf16.mxu0 %v797_v0  ;;  %v683_v50 = vpack.c.bf16 %v364_v49, %v363_v48  ;;  %v530_v60 = vld [vmem:[%s956_s4] ss:$0 sm:$0xff] }
  0x51   : > { %669 = vmatpush3.bf16.msra.mxu1 %v668_v24 }
  0x52   : > { %648 = vmatpush3.bf16.msra.mxu0 %v647_v21  ;;  %670 = vmatprep.subr.bf16.mxu1 %v797_v0 }
  0x53   : > { %649 = vmatprep.subr.bf16.mxu0 %v797_v0 }
  0x55   : > { %672 = vmatpush3.bf16.msra.mxu1 %v671_v38 }
  0x56   : > { %651 = vmatpush3.bf16.msra.mxu0 %v650_v25  ;;  %673 = vmatprep.subr.bf16.mxu1 %v797_v0 }
  0x57   : > { %652 = vmatprep.subr.bf16.mxu0 %v797_v0 }
  0x59   : > { %675 = vmatpush3.bf16.msra.mxu1 %v674_v41 }
  0x5a   : > { %654 = vmatpush3.bf16.msra.mxu0 %v653_v28  ;;  %676 = vmatprep.subr.bf16.mxu1 %v797_v0 }
  0x5b   : > { %655 = vmatprep.subr.bf16.mxu0 %v797_v0 }
  0x5d   : > { %678 = vmatpush3.bf16.msra.mxu1 %v677_v44 }
  0x5e   : > { %657 = vmatpush3.bf16.msra.mxu0 %v656_v31  ;;  %679 = vmatprep.subr.bf16.mxu1 %v797_v0 }
  0x5f   : > { %658 = vmatprep.subr.bf16.mxu0 %v797_v0 }
  0x61   : > { %681 = vmatpush3.bf16.msra.mxu1 %v680_v47 }
  0x62   : > { %660 = vmatpush3.bf16.msra.mxu0 %v659_v34  ;;  %682 = vmatprep.subr.bf16.mxu1 %v797_v0 }
  0x65   : > { %600 = vmatmul.mubr.f32.vlgmr.msra.gmra.mrb[0].mxu0 %v250_v35  ;;  %684 = vmatpush3.bf16.msra.mxu1 %v683_v50 }
 0x138   : > { %v340_v52 = vpop.f32.mrb[0].mxu0 }
 0x139   : > { %v341_v53 = vadd.f32 %v529_v51, %v340_v52  ;;  %v601_v54 = vpop.f32.mrb[1].mxu0 }
 0x13b   : > { %v345_v55 = vmul.f32 0.70710677, %v341_v53  ;;  %v344_v57 = vmul.f32 0.5, %v341_v53 }
 0x13d   : > { %719 = verf.f32 %v345_v55 }
 0x147   : > { %v720_v56 = vpop.eup %719 }
 0x148   : > { %v347_v58 = vadd.f32 1.0, %v720_v56 }
 0x14a   : > { %v348_v59 = vmul.f32 %v347_v58, %v344_v57 }
 0x14c   : > { %635 = vmatmul.mubr.f32.vlgmr.msra.gmra.mrb[0].mxu1 %v348_v59 }
 0x21f   : > { %v438_v61 = vpop.f32.mrb[0].mxu1 }
 0x220   : > { %v439_v62 = vadd.f32 %v530_v60, %v438_v61  ;;  %v636_v63 = vpop.f32.mrb[1].mxu1 }
 0x222   : > { %442 = vst [vmem:[%s249_s10] sm:$0xff] %v439_v62 }
 0x223 PF: > { %s17_s18 = sadd.s32 1, %s791_s18  }
 0x224   : > { %p14_p9 = scmp.ge.s32.totalorder %s17_s18, 4  }
 0x226   :  { %16 = sbr.rel (!%p14_p9) target bundleno = 2 (0x2), region = 79 }
 0x22d   :  { %462 = vsyncpa [#allocation3], 1 }
 0x22e   :  { %464 = vsyncpa [#allocation3 + $0x1], 1 }
 0x22f   :  { %465 = vsyncpa [#allocation5], 1 }

</bundles_post_ra>
